<compile_context>
chip_gen: v7x
topology: tpu7x:2x2x1
jax: 0.10.0
libtpu: 0.0.40
codegen_flags: <defaults>
</compile_context>

<pallas_src>
import jax
import jax.numpy as jnp
from jax.experimental import pallas as pl
from jax.experimental.pallas import tpu as pltpu

LANE = 128
SUBLANE = 8


def _round_up(n, m):
    return ((n + m - 1) // m) * m


# ----------------------------------------------------------------------------
# Kernel
# ----------------------------------------------------------------------------
def _teacher_mlp_kernel(x_ref, w1_ref, b1_ref, w2_ref, b2_ref, o_ref, acc_ref):
    # x_ref  : [TB, TD] f32 input tile (cast to bf16 on the VPU here)
    # w1_ref : [TD, H ] bf16 first-layer K-tile (H = true hidden width, unpadded)
    # b1_ref : [1,  H ] f32 first bias
    # w2_ref : [H,  Cp] bf16 second-layer weight (class dim lane-padded)
    # b2_ref : [1,  Cp] f32 second bias
    # o_ref  : [TB, Cp] f32 padded logits (lane-dense unmasked stores)
    # acc_ref: [TB, H ] f32 accumulator scratch for the K reduction
    k = pl.program_id(1)

    @pl.when(k == 0)
    def _():
        acc_ref[...] = jnp.zeros_like(acc_ref)

    x = x_ref[...].astype(jnp.bfloat16)
    acc_ref[...] += jnp.dot(x, w1_ref[...], preferred_element_type=jnp.float32)

    @pl.when(k == pl.num_programs(1) - 1)
    def _():
        h = jnp.maximum(acc_ref[...] + b1_ref[...], 0.0)           # f32 bias+ReLU
        h = h.astype(jnp.bfloat16)
        logits = jnp.dot(h, w2_ref[...], preferred_element_type=jnp.float32)
        o_ref[...] = (logits + b2_ref[...]).astype(o_ref.dtype)


# ----------------------------------------------------------------------------
# Tiling / VMEM budgeting
# ----------------------------------------------------------------------------
def _vmem_budget_bytes():
    """Per-generation usable VMEM budget (leave compiler headroom)."""
    phys = None
    try:
        info = pltpu.get_tpu_info()
        phys = getattr(info, "vmem_capacity_bytes", None)
    except Exception:
        phys = None
    if not phys:
        phys = 64 << 20                      # conservative fallback (v7x-class)
    if phys <= (64 << 20):                   # v7x: 64 MiB/TC physical
        budget = min(phys - (12 << 20), 52 << 20)
    else:                                    # v5e/v6e: 128 MiB physical
        budget = min(phys - (24 << 20), 104 << 20)
    return max(budget, 16 << 20)


def _choose_batch_tile(B, Dp, tb_cap):
    """Pick TB (multiple of 8, <= tb_cap) balancing padding waste, per-step
    overhead amortization, and >=2 grid steps for megacore on large batches."""
    B8 = _round_up(B, SUBLANE)
    tb_cap = max(SUBLANE, (tb_cap // SUBLANE) * SUBLANE)
    if B8 <= tb_cap:
        if B8 >= 256:
            # Split into two tiles of >=128 rows so the parallel batch axis can
            # shard across both v7x TensorCores (pads at most 8 rows).
            return _round_up(pl.cdiv(B8, 2), SUBLANE)
        return B8
    # Batch spans multiple tiles: score round_up padding + per-step overhead
    # (~0.35 us/step expressed in equivalent HBM rows of the f32 x stream).
    overhead_rows = max(SUBLANE,
                        ((350_000 // max(Dp * 4, 1)) // SUBLANE) * SUBLANE)
    best_tb, best_cost = tb_cap, None
    tb = tb_cap
    while tb >= SUBLANE:
        steps = pl.cdiv(B8, tb)
        cost = steps * tb + steps * overhead_rows
        if best_cost is None or cost < best_cost:
            best_tb, best_cost = tb, cost
        tb -= SUBLANE
    return best_tb


def _choose_tiling(B, Dp, H, Cp, vmem_budget):
    """Pick (TB, TD) so the double-buffered working set fits vmem_budget."""
    def vmem_bytes(tb, td):
        return (2 * tb * td * 4               # x tile, f32, double-buffered
                + 2 * td * H * 2              # w1 K-tile, bf16, double-buffered
                + 2 * tb * Cp * 4             # out tile, f32, double-buffered
                + tb * max(H, LANE) * 4       # f32 accumulator (lane-padded)
                + 2 * (H * Cp * 2 + (H + Cp) * 4))   # w2 / b1 / b2

    # Largest batch tile that still fits with the minimum (128) K tile.
    tb_cap = 1024
    while tb_cap > SUBLANE and vmem_bytes(tb_cap, LANE) > vmem_budget:
        tb_cap //= 2
    tb = _choose_batch_tile(B, Dp, tb_cap)

    # Largest K tile (multiple of 128, dividing Dp) within the remaining budget.
    avail = (vmem_budget
             - 2 * tb * Cp * 4 - tb * max(H, LANE) * 4
             - 2 * (H * Cp * 2 + (H + Cp) * 4))
    td = (avail // (8 * tb + 4 * H)) // LANE * LANE
    td = max(LANE, min(td, Dp))
    while Dp % td != 0:                       # keep Dp an exact multiple of TD
        td -= LANE
    return tb, max(td, LANE)


# ----------------------------------------------------------------------------
# pallas_call wrapper
# ----------------------------------------------------------------------------
def teacher_forward_pallas(x_flat, w1, b1, w2, b2, *, block_b, block_d,
                           vmem_limit):
    """Batch- and K-tiled pipelined teacher MLP.

    x_flat: [Bp, Dp] f32 (Bp % block_b == 0, Dp % block_d == 0)
    w1    : [Dp, H ] bf16 (hidden dim unpadded)
    b1    : [1,  H ] f32
    w2    : [H,  Cp] bf16 (class dim lane-padded)
    b2    : [1,  Cp] f32
    """
    Bp, Dp = x_flat.shape
    H = w1.shape[1]
    Cp = w2.shape[1]
    TB, TD = block_b, block_d
    assert Bp % TB == 0 and TB % SUBLANE == 0
    assert Dp % TD == 0 and TD % LANE == 0
    assert Cp % LANE == 0 and w1.shape[0] == Dp and w2.shape[0] == H
    nb, nk = Bp // TB, Dp // TD

    # Advisory cost estimate for XLA's scheduler around the custom call.
    flops = 2 * Bp * (Dp * H + H * Cp)
    bytes_accessed = (Bp * Dp * 4                 # x stream
                      + nb * Dp * H * 2           # w1 re-streamed per batch tile
                      + H * Cp * 2 + (H + Cp) * 4
                      + Bp * Cp * 4)              # padded logits out

    return pl.pallas_call(
        _teacher_mlp_kernel,
        out_shape=jax.ShapeDtypeStruct((Bp, Cp), jnp.float32),
        grid_spec=pltpu.PrefetchScalarGridSpec(
            num_scalar_prefetch=0,
            grid=(nb, nk),                                    # K axis last
            in_specs=[
                pl.BlockSpec((TB, TD), lambda i, k: (i, k)),  # x tile (pipelined)
                pl.BlockSpec((TD, H), lambda i, k: (k, 0)),   # w1 K-tile (pipelined)
                pl.BlockSpec((1, H), lambda i, k: (0, 0)),    # b1 (resident)
                pl.BlockSpec((H, Cp), lambda i, k: (0, 0)),   # w2 (resident)
                pl.BlockSpec((1, Cp), lambda i, k: (0, 0)),   # b2 (resident)
            ],
            out_specs=pl.BlockSpec((TB, Cp), lambda i, k: (i, 0)),
            scratch_shapes=[pltpu.VMEM((TB, H), jnp.float32)],
        ),
        compiler_params=pltpu.CompilerParams(
            dimension_semantics=("parallel", "arbitrary"),
            vmem_limit_bytes=int(vmem_limit),
        ),
        cost_estimate=pl.CostEstimate(
            flops=flops, transcendentals=0, bytes_accessed=bytes_accessed),
    )(x_flat, w1, b1, w2, b2)


# ----------------------------------------------------------------------------
# Module wrapper
# ----------------------------------------------------------------------------
class TeacherWrapper:
    """JAX/Pallas port of the PyTorch TeacherWrapper (nn.Module / is_dl path).

    The teacher is a deterministic synthetic 2-layer MLP whose forward runs
    inside one batch+K-tiled Pallas kernel.
    """

    def __init__(self, in_features, hidden, num_classes, key):
        self.is_dl = True  # synthetic teacher is a DL model
        self.num_classes = num_classes
        self.in_features = in_features
        Dp = _round_up(in_features, LANE)
        Cp = _round_up(num_classes, LANE)

        k1, k2, k3, k4 = jax.random.split(key, 4)
        w1 = (jax.random.normal(k1, (in_features, hidden), jnp.float32)
              / jnp.sqrt(jnp.float32(in_features)))
        b1 = jax.random.normal(k2, (1, hidden), jnp.float32) * 0.01
        w2 = (jax.random.normal(k3, (hidden, num_classes), jnp.float32)
              / jnp.sqrt(jnp.float32(hidden)))
        b2 = jax.random.normal(k4, (1, num_classes), jnp.float32) * 0.01

        # Only the input-feature (K) dim of w1 is zero-padded (to a 128
        # multiple, so K-tiling divides evenly) and the class dim of w2/b2
        # (lane-dense output stores).  The hidden dim stays at its true width
        # — no 4x padding of w1 HBM traffic / VMEM residency.
        self.w1 = jnp.pad(w1, ((0, Dp - in_features), (0, 0))).astype(jnp.bfloat16)
        self.b1 = b1                                                        # f32
        self.w2 = jnp.pad(w2, ((0, 0), (0, Cp - num_classes))).astype(jnp.bfloat16)
        self.b2 = jnp.pad(b2, ((0, 0), (0, Cp - num_classes)))              # f32
        # TODO(synk): non-DL (sklearn predict_proba) branch has no Pallas
        # equivalent; only the is_dl branch is implemented.

    def __call__(self, x_nchw):
        # Matches `return (self.teacher(x.to(self.device)), False)`.
        B = x_nchw.shape[0]
        feat = 1
        for s in x_nchw.shape[1:]:
            feat *= s
        assert feat == self.in_features, (
            f"flattened feature size {feat} != in_features {self.in_features}")

        x_flat = x_nchw.reshape(B, -1)                    # contiguous, no copy
        Dp = self.w1.shape[0]
        H = self.w1.shape[1]
        Cp = self.w2.shape[1]
        if Dp != feat:                                    # zero-pad K to 128 mult
            x_flat = jnp.pad(x_flat, ((0, 0), (0, Dp - feat)))

        vmem_budget = _vmem_budget_bytes()
        TB, TD = _choose_tiling(B, Dp, H, Cp, vmem_budget)
        Bp = _round_up(B, TB)
        if Bp != B:
            x_flat = jnp.pad(x_flat, ((0, Bp - B), (0, 0)))

        logits_padded = teacher_forward_pallas(
            x_flat, self.w1, self.b1, self.w2, self.b2,
            block_b=TB, block_d=TD, vmem_limit=vmem_budget)
        # TODO(synk): consumers that accept padded/bf16 logits could take
        # logits_padded directly and skip this slice.
        return logits_padded[:B, :self.num_classes], False


def _reference_forward(x_nchw, w1_bf16, b1, w2_bf16, b2, num_classes):
    """Plain-XLA reference replicating the kernel's bf16-matmul / f32-acc math."""
    B = x_nchw.shape[0]
    x = x_nchw.reshape(B, -1)
    Dp = w1_bf16.shape[0]
    if x.shape[1] != Dp:
        x = jnp.pad(x, ((0, 0), (0, Dp - x.shape[1])))
    x = x.astype(jnp.bfloat16)
    h = jnp.dot(x, w1_bf16, preferred_element_type=jnp.float32) + b1
    h = jnp.maximum(h, 0.0).astype(jnp.bfloat16)
    logits = jnp.dot(h, w2_bf16, preferred_element_type=jnp.float32) + b2
    return logits[:, :num_classes]


if __name__ == "__main__":
    key = jax.random.PRNGKey(0)
    k_x, k_p = jax.random.split(key)

    # Small NCHW input consistent with an image-classifier teacher.
    B, C_in, Hs, Ws = 2, 4, 16, 16
    hidden, num_classes = 32, 10
    x = jax.random.normal(k_x, (B, C_in, Hs, Ws), jnp.float32)

    wrapper = TeacherWrapper(in_features=C_in * Hs * Ws,
                             hidden=hidden,
                             num_classes=num_classes,
                             key=k_p)

    logits, is_proba = wrapper(x)
    logits = jax.block_until_ready(logits)

    ref = _reference_forward(x, wrapper.w1, wrapper.b1, wrapper.w2, wrapper.b2,
                             num_classes)
    assert logits.shape == (B, num_classes)
    assert is_proba is False
    assert jnp.allclose(logits, ref, atol=2e-3, rtol=2e-3), (
        jnp.max(jnp.abs(logits - ref)))

    print("KERNEL_OK")
</pallas_src>

<mosaic_0001>
module attributes {stable_mosaic.version = 11 : i64} {
  func.func @_teacher_mlp_kernel(%arg0: i32, %arg1: i32, %arg2: memref<8x1024xf32, #tpu.memory_space<vmem>>, %arg3: memref<1024x32xbf16, #tpu.memory_space<vmem>>, %arg4: memref<1x32xf32, #tpu.memory_space<vmem>>, %arg5: memref<32x128xbf16, #tpu.memory_space<vmem>>, %arg6: memref<1x128xf32, #tpu.memory_space<vmem>>, %arg7: memref<8x128xf32, #tpu.memory_space<vmem>>, %arg8: memref<8x32xf32, #tpu.memory_space<vmem>>) attributes {dimension_semantics = [#tpu.dimension_semantics<parallel>, #tpu.dimension_semantics<arbitrary>], iteration_bounds = array<i64: 1, 1>, scalar_prefetch = 0 : i64, scratch_operands = 1 : i64, tpu.core_type = #tpu.core_type<tc>, window_params = [{transform_indices = @transform_0, window_bounds = array<i64: 8, 1024>}, {transform_indices = @transform_1, window_bounds = array<i64: 1024, 32>}, {pipeline_mode = #tpu.pipeline_mode<synchronous>, transform_indices = @transform_2, window_bounds = array<i64: 1, 32>}, {pipeline_mode = #tpu.pipeline_mode<synchronous>, transform_indices = @transform_3, window_bounds = array<i64: 32, 128>}, {pipeline_mode = #tpu.pipeline_mode<synchronous>, transform_indices = @transform_4, window_bounds = array<i64: 1, 128>}, {transform_indices = @transform_5, window_bounds = array<i64: 8, 128>}]} {
    %c0_i32 = arith.constant 0 : i32
    %0 = arith.cmpi eq, %arg1, %c0_i32 : i32
    %1 = arith.extui %0 : i1 to i32
    %c0_i32_0 = arith.constant 0 : i32
    %2 = arith.cmpi ne, %1, %c0_i32_0 : i32
    scf.if %2 {
      %cst_10 = arith.constant 0.000000e+00 : f32
      %13 = vector.broadcast %cst_10 : f32 to vector<8x32xf32>
      %c0_11 = arith.constant 0 : index
      %c0_12 = arith.constant 0 : index
      %14 = vector.load %arg8[%c0_11, %c0_12] : memref<8x32xf32, #tpu.memory_space<vmem>>, vector<8x32xf32>
      tpu.vector_store %arg8[%c0_11, %c0_12], %13 {strides = array<i32>} : memref<8x32xf32, #tpu.memory_space<vmem>>, vector<8x32xf32>,
    } else {
    }
    %c0 = arith.constant 0 : index
    %c0_1 = arith.constant 0 : index
    %3 = vector.load %arg2[%c0, %c0_1] : memref<8x1024xf32, #tpu.memory_space<vmem>>, vector<8x1024xf32>
    %4 = arith.truncf %3 : vector<8x1024xf32> to vector<8x1024xbf16>
    %c0_2 = arith.constant 0 : index
    %c0_3 = arith.constant 0 : index
    %5 = vector.load %arg8[%c0_2, %c0_3] : memref<8x32xf32, #tpu.memory_space<vmem>>, vector<8x32xf32>
    %c0_4 = arith.constant 0 : index
    %c0_5 = arith.constant 0 : index
    %6 = vector.load %arg3[%c0_4, %c0_5] : memref<1024x32xbf16, #tpu.memory_space<vmem>>, vector<1024x32xbf16>
    %cst = arith.constant dense<0.000000e+00> : vector<8x32xf32>
    %7 = tpu.matmul %4, %6, %cst {dimension_numbers = #tpu.dot_dimension_numbers<[1], [0], [0], [1], [0, 0, 1, 1], [], []>} : vector<8x1024xbf16>, vector<1024x32xbf16>, vector<8x32xf32> -> vector<8x32xf32>
    %8 = arith.addf %5, %7 : vector<8x32xf32>
    %c0_6 = arith.constant 0 : index
    %c0_7 = arith.constant 0 : index
    %9 = vector.load %arg8[%c0_6, %c0_7] : memref<8x32xf32, #tpu.memory_space<vmem>>, vector<8x32xf32>
    tpu.vector_store %arg8[%c0_6, %c0_7], %8 {strides = array<i32>} : memref<8x32xf32, #tpu.memory_space<vmem>>, vector<8x32xf32>,
    %c0_i32_8 = arith.constant 0 : i32
    %10 = arith.cmpi eq, %arg1, %c0_i32_8 : i32
    %11 = arith.extui %10 : i1 to i32
    %c0_i32_9 = arith.constant 0 : i32
    %12 = arith.cmpi ne, %11, %c0_i32_9 : i32
    scf.if %12 {
      %c0_10 = arith.constant 0 : index
      %c0_11 = arith.constant 0 : index
      %13 = vector.load %arg8[%c0_10, %c0_11] : memref<8x32xf32, #tpu.memory_space<vmem>>, vector<8x32xf32>
      %c0_12 = arith.constant 0 : index
      %c0_13 = arith.constant 0 : index
      %14 = vector.load %arg4[%c0_12, %c0_13] : memref<1x32xf32, #tpu.memory_space<vmem>>, vector<1x32xf32>
      %15 = vector.broadcast %14 : vector<1x32xf32> to vector<8x32xf32>
      %16 = arith.addf %13, %15 : vector<8x32xf32>
      %cst_14 = arith.constant 0.000000e+00 : f32
      %17 = vector.broadcast %cst_14 : f32 to vector<8x32xf32>
      %18 = arith.maximumf %16, %17 : vector<8x32xf32>
      %19 = arith.truncf %18 : vector<8x32xf32> to vector<8x32xbf16>
      %c0_15 = arith.constant 0 : index
      %c0_16 = arith.constant 0 : index
      %20 = vector.load %arg5[%c0_15, %c0_16] : memref<32x128xbf16, #tpu.memory_space<vmem>>, vector<32x128xbf16>
      %cst_17 = arith.constant dense<0.000000e+00> : vector<8x128xf32>
      %21 = tpu.matmul %19, %20, %cst_17 {dimension_numbers = #tpu.dot_dimension_numbers<[1], [0], [0], [1], [0, 0, 1, 1], [], []>} : vector<8x32xbf16>, vector<32x128xbf16>, vector<8x128xf32> -> vector<8x128xf32>
      %c0_18 = arith.constant 0 : index
      %c0_19 = arith.constant 0 : index
      %22 = vector.load %arg6[%c0_18, %c0_19] : memref<1x128xf32, #tpu.memory_space<vmem>>, vector<1x128xf32>
      %23 = vector.broadcast %22 : vector<1x128xf32> to vector<8x128xf32>
      %24 = arith.addf %21, %23 : vector<8x128xf32>
      %c0_20 = arith.constant 0 : index
      %c0_21 = arith.constant 0 : index
      %25 = vector.load %arg7[%c0_20, %c0_21] : memref<8x128xf32, #tpu.memory_space<vmem>>, vector<8x128xf32>
      tpu.vector_store %arg7[%c0_20, %c0_21], %24 {strides = array<i32>} : memref<8x128xf32, #tpu.memory_space<vmem>>, vector<8x128xf32>,
    } else {
    }
    return
  }
  func.func @transform_0(%arg0: i32, %arg1: i32) -> (i32, i32) {
    %c0_i32 = arith.constant 0 : i32
    return %arg0, %arg1 : i32, i32
  }
  func.func @transform_1(%arg0: i32, %arg1: i32) -> (i32, i32) {
    %c0_i32 = arith.constant 0 : i32
    %c0_i32_0 = arith.constant 0 : i32
    return %arg1, %c0_i32 : i32, i32
  }
  func.func @transform_2(%arg0: i32, %arg1: i32) -> (i32, i32) {
    %c0_i32 = arith.constant 0 : i32
    %c0_i32_0 = arith.constant 0 : i32
    %c0_i32_1 = arith.constant 0 : i32
    return %c0_i32, %c0_i32_0 : i32, i32
  }
  func.func @transform_3(%arg0: i32, %arg1: i32) -> (i32, i32) {
    %c0_i32 = arith.constant 0 : i32
    %c0_i32_0 = arith.constant 0 : i32
    %c0_i32_1 = arith.constant 0 : i32
    return %c0_i32, %c0_i32_0 : i32, i32
  }
  func.func @transform_4(%arg0: i32, %arg1: i32) -> (i32, i32) {
    %c0_i32 = arith.constant 0 : i32
    %c0_i32_0 = arith.constant 0 : i32
    %c0_i32_1 = arith.constant 0 : i32
    return %c0_i32, %c0_i32_0 : i32, i32
  }
  func.func @transform_5(%arg0: i32, %arg1: i32) -> (i32, i32) {
    %c0_i32 = arith.constant 0 : i32
    %c0_i32_0 = arith.constant 0 : i32
    return %arg0, %c0_i32 : i32, i32
  }
}

</mosaic_0001>

<bundles_post_ra>
// kernel: tpu_custom_call.1
= control target key start
LH: loop header
LB: loop body
LE: loop exit
PB: predicated region body
PF: predicated region fallthrough
CT: control target
= control target key end

     0   :  { %s1352_s0 = inlined_call_operand.vmem [shape: f32[8,1024], index: 0, kind: input, shape index: {}]   ;;  %s1353_s1 = inlined_call_operand.vmem [shape: bf16[1024,32], index: 1, kind: input, shape index: {}]   ;;  %s1354_s2 = inlined_call_operand.vmem [shape: f32[1,32], index: 2, kind: input, shape index: {}]   ;;  %s1355_s3 = inlined_call_operand.vmem [shape: bf16[32,128], index: 3, kind: input, shape index: {}]   ;;  %s1356_s4 = inlined_call_operand.vmem [shape: f32[1,128], index: 4, kind: input, shape index: {}]   ;;  %s1357_s5 = inlined_call_operand.hbm [shape: f32[8,128], index: 5, kind: output, shape index: {}]  }
   0x1   :  { %v986_v0 = vld [vmem:[%s1353_s1 + $0x40] sm:$0xff]   ;;  %v990_v4 = vld [vmem:[%s1353_s1 + $0x48] sm:$0xff]   ;;  %v994_v8 = vld [vmem:[%s1353_s1 + $0x50] sm:$0xff]  }
   0x2   :  { %v987_v1 = vld [vmem:[%s1353_s1 + $0xc0] sm:$0xff]   ;;  %884 = vmatprep.subr.bf16.mxu0 %v986_v0  ;;  %v991_v5 = vld [vmem:[%s1353_s1 + $0xc8] sm:$0xff]   ;;  %v995_v9 = vld [vmem:[%s1353_s1 + $0xd0] sm:$0xff]  }
   0x3   :  { %v988_v2 = vld [vmem:[%s1353_s1] sm:$0xff]   ;;  %906 = vmatprep.subr.bf16.mxu1 %v987_v1  ;;  %v992_v6 = vld [vmem:[%s1353_s1 + $0x8] sm:$0xff]   ;;  %v996_v10 = vld [vmem:[%s1353_s1 + $0x10] sm:$0xff]  }
   0x4   :  { %v989_v3 = vld [vmem:[%s1353_s1 + $0x80] sm:$0xff]   ;;  %885 = vmatpush3.bf16.msra.mxu0 %v988_v2  ;;  %v993_v7 = vld [vmem:[%s1353_s1 + $0x88] sm:$0xff]   ;;  %v997_v11 = vld [vmem:[%s1353_s1 + $0x90] sm:$0xff]  }
   0x5   :  { %907 = vmatpush3.bf16.msra.mxu1 %v989_v3  ;;  %886 = vmatprep.subr.bf16.mxu0 %v990_v4  ;;  %v998_v12 = vld [vmem:[%s1353_s1 + $0x58] sm:$0xff]   ;;  %v1002_v16 = vld [vmem:[%s1353_s1 + $0x60] sm:$0xff]   ;;  %v1006_v20 = vld [vmem:[%s1353_s1 + $0x68] sm:$0xff]  }
   0x6   :  { %908 = vmatprep.subr.bf16.mxu1 %v991_v5  ;;  %v999_v13 = vld [vmem:[%s1353_s1 + $0xd8] sm:$0xff]   ;;  %v1003_v17 = vld [vmem:[%s1353_s1 + $0xe0] sm:$0xff]   ;;  %v1007_v21 = vld [vmem:[%s1353_s1 + $0xe8] sm:$0xff]  }
   0x7   :  { %v1000_v14 = vld [vmem:[%s1353_s1 + $0x18] sm:$0xff]   ;;  %v1004_v18 = vld [vmem:[%s1353_s1 + $0x20] sm:$0xff]   ;;  %v1008_v22 = vld [vmem:[%s1353_s1 + $0x28] sm:$0xff]  }
   0x8   :  { %887 = vmatpush3.bf16.msra.mxu0 %v992_v6  ;;  %v1001_v15 = vld [vmem:[%s1353_s1 + $0x98] sm:$0xff]   ;;  %v1005_v19 = vld [vmem:[%s1353_s1 + $0xa0] sm:$0xff]   ;;  %v1009_v23 = vld [vmem:[%s1353_s1 + $0xa8] sm:$0xff]  }
   0x9   :  { %909 = vmatpush3.bf16.msra.mxu1 %v993_v7  ;;  %888 = vmatprep.subr.bf16.mxu0 %v994_v8  ;;  %v1010_v24 = vld [vmem:[%s1353_s1 + $0x70] sm:$0xff]   ;;  %v1014_v28 = vld [vmem:[%s1353_s1 + $0x78] sm:$0xff]   ;;  %v29_v32 = vld [vmem:[%s1352_s0 + $0x8] sm:$0xff] }
   0xa   :  { %910 = vmatprep.subr.bf16.mxu1 %v995_v9  ;;  %v1011_v25 = vld [vmem:[%s1353_s1 + $0xf0] sm:$0xff]   ;;  %v1015_v29 = vld [vmem:[%s1353_s1 + $0xf8] sm:$0xff]   ;;  %v28_v34 = vld [vmem:[%s1352_s0] sm:$0xff]  ;;  %v37_v35 = vpack.c.bf16 %v29_v32, %v29_v32 }
   0xb   :  { %v1012_v26 = vld [vmem:[%s1353_s1 + $0x30] sm:$0xff]   ;;  %v1016_v30 = vld [vmem:[%s1353_s1 + $0x38] sm:$0xff]   ;;  %v36_v37 = vpack.c.bf16 %v28_v34, %v28_v34  ;;  %v1018_v40 = vld [vmem:[%s1353_s1 + $0x140] sm:$0xff]  }
   0xc   :  { %889 = vmatpush3.bf16.msra.mxu0 %v996_v10  ;;  %v1013_v27 = vld [vmem:[%s1353_s1 + $0xb0] sm:$0xff]   ;;  %v1017_v31 = vld [vmem:[%s1353_s1 + $0xb8] sm:$0xff]   ;;  %589 = vmatprep.mubr.bf16.mxu0 %v37_v35  ;;  %v1019_v41 = vld [vmem:[%s1353_s1 + $0x1c0] sm:$0xff]  }
   0xd   :  { %911 = vmatpush3.bf16.msra.mxu1 %v997_v11  ;;  %890 = vmatprep.subr.bf16.mxu0 %v998_v12  ;;  %v31_v33 = vld [vmem:[%s1352_s0 + $0x18] sm:$0xff]  ;;  %v30_v38 = vld [vmem:[%s1352_s0 + $0x10] sm:$0xff]  ;;  %v1020_v42 = vld [vmem:[%s1353_s1 + $0x100] sm:$0xff]  }
   0xe   :  { %912 = vmatprep.subr.bf16.mxu1 %v999_v13  ;;  %v39_v36 = vpack.c.bf16 %v31_v33, %v31_v33  ;;  %v38_v39 = vpack.c.bf16 %v30_v38, %v30_v38  ;;  %v1021_v43 = vld [vmem:[%s1353_s1 + $0x180] sm:$0xff]   ;;  %v1022_v44 = vld [vmem:[%s1353_s1 + $0x148] sm:$0xff]   ;;  %v1026_v48 = vld [vmem:[%s1353_s1 + $0x150] sm:$0xff]  }
   0xf   :  { %v1023_v45 = vld [vmem:[%s1353_s1 + $0x1c8] sm:$0xff]   ;;  %v1027_v49 = vld [vmem:[%s1353_s1 + $0x1d0] sm:$0xff]   ;;  %v1030_v52 = vld [vmem:[%s1353_s1 + $0x158] sm:$0xff]  }
  0x10   :  { %891 = vmatpush3.bf16.msra.mxu0 %v1000_v14  ;;  %629 = vmatprep.mubr.bf16.mxu1 %v39_v36  ;;  %v1024_v46 = vld [vmem:[%s1353_s1 + $0x108] sm:$0xff]   ;;  %v1028_v50 = vld [vmem:[%s1353_s1 + $0x110] sm:$0xff]   ;;  %v1031_v53 = vld [vmem:[%s1353_s1 + $0x1d8] sm:$0xff]  }
  0x11   :  { %913 = vmatpush3.bf16.msra.mxu1 %v1001_v15  ;;  %892 = vmatprep.subr.bf16.mxu0 %v1002_v16  ;;  %v1025_v47 = vld [vmem:[%s1353_s1 + $0x188] sm:$0xff]   ;;  %v1029_v51 = vld [vmem:[%s1353_s1 + $0x190] sm:$0xff]   ;;  %v1032_v54 = vld [vmem:[%s1353_s1 + $0x118] sm:$0xff]  }
  0x12   :  { %914 = vmatprep.subr.bf16.mxu1 %v1003_v17  ;;  %v1033_v55 = vld [vmem:[%s1353_s1 + $0x198] sm:$0xff]   ;;  %v1034_v56 = vld [vmem:[%s1353_s1 + $0x160] sm:$0xff]   ;;  %v1038_v60 = vld [vmem:[%s1353_s1 + $0x168] sm:$0xff]  }
  0x13   :  { %v1035_v57 = vld [vmem:[%s1353_s1 + $0x1e0] sm:$0xff]   ;;  %v1039_v61 = vld [vmem:[%s1353_s1 + $0x1e8] sm:$0xff]   ;;  %v1042_v0 = vld [vmem:[%s1353_s1 + $0x170] sm:$0xff]  }
  0x14   :  { %893 = vmatpush3.bf16.msra.mxu0 %v1004_v18  ;;  %v1036_v58 = vld [vmem:[%s1353_s1 + $0x120] sm:$0xff]   ;;  %v1040_v62 = vld [vmem:[%s1353_s1 + $0x128] sm:$0xff]   ;;  %v1043_v1 = vld [vmem:[%s1353_s1 + $0x1f0] sm:$0xff]  }
  0x15   :  { %915 = vmatpush3.bf16.msra.mxu1 %v1005_v19  ;;  %894 = vmatprep.subr.bf16.mxu0 %v1006_v20  ;;  %v1037_v59 = vld [vmem:[%s1353_s1 + $0x1a0] sm:$0xff]   ;;  %v1041_v63 = vld [vmem:[%s1353_s1 + $0x1a8] sm:$0xff]   ;;  %v1044_v2 = vld [vmem:[%s1353_s1 + $0x130] sm:$0xff]  }
  0x16   :  { %916 = vmatprep.subr.bf16.mxu1 %v1007_v21  ;;  %v1045_v3 = vld [vmem:[%s1353_s1 + $0x1b0] sm:$0xff]   ;;  %v1046_v4 = vld [vmem:[%s1353_s1 + $0x178] sm:$0xff]   ;;  %v33_v8 = vld [vmem:[%s1352_s0 + $0x28] sm:$0xff] }
  0x17   :  { %v1047_v5 = vld [vmem:[%s1353_s1 + $0x1f8] sm:$0xff]   ;;  %v41_v10 = vpack.c.bf16 %v33_v8, %v33_v8  ;;  %v32_v12 = vld [vmem:[%s1352_s0 + $0x20] sm:$0xff]  ;;  %v34_v13 = vld [vmem:[%s1352_s0 + $0x30] sm:$0xff] }
  0x18   :  { %895 = vmatpush3.bf16.msra.mxu0 %v1008_v22  ;;  %v1048_v6 = vld [vmem:[%s1353_s1 + $0x138] sm:$0xff]   ;;  %v40_v14 = vpack.c.bf16 %v32_v12, %v32_v12  ;;  %v42_v15 = vpack.c.bf16 %v34_v13, %v34_v13 }
  0x19   :  { %917 = vmatpush3.bf16.msra.mxu1 %v1009_v23  ;;  %896 = vmatprep.subr.bf16.mxu0 %v1010_v24  ;;  %v1049_v7 = vld [vmem:[%s1353_s1 + $0x1b8] sm:$0xff]  }
  0x1a   :  { %918 = vmatprep.subr.bf16.mxu1 %v1011_v25  ;;  %v35_v9 = vld [vmem:[%s1352_s0 + $0x38] sm:$0xff] }
  0x1b   :  { %v43_v11 = vpack.c.bf16 %v35_v9, %v35_v9 }
  0x1c   :  { %897 = vmatpush3.bf16.msra.mxu0 %v1012_v26 }
  0x1d   :  { %919 = vmatpush3.bf16.msra.mxu1 %v1013_v27  ;;  %898 = vmatprep.subr.bf16.mxu0 %v1014_v28 }
  0x1e   :  { %920 = vmatprep.subr.bf16.mxu1 %v1015_v29 }
  0x20   :  { %899 = vmatpush3.bf16.msra.mxu0 %v1016_v30 }
  0x21   :  { %921 = vmatpush3.bf16.msra.mxu1 %v1017_v31  ;;  %928 = vmatprep.subr.bf16.mxu0 %v1018_v40 }
  0x22   :  { %950 = vmatprep.subr.bf16.mxu1 %v1019_v41 }
  0x23   :  { %590 = vmatmul.mubr.bf16.vlgmr.msra.gmra.mrb[0].mxu0 %v36_v37 }
  0x24   :  { %630 = vmatmul.mubr.bf16.vlgmr.msra.gmra.mrb[0].mxu1 %v38_v39  ;;  %929 = vmatpush3.bf16.msra.mxu0 %v1020_v42 }
  0x25   :  { %951 = vmatpush3.bf16.msra.mxu1 %v1021_v43  ;;  %930 = vmatprep.subr.bf16.mxu0 %v1022_v44 }
  0x26   :  { %952 = vmatprep.subr.bf16.mxu1 %v1023_v45  ;;  %669 = vmatprep.mubr.bf16.mxu0 %v41_v10 }
  0x27   :  { %709 = vmatprep.mubr.bf16.mxu1 %v43_v11 }
  0x28   :  { %931 = vmatpush3.bf16.msra.mxu0 %v1024_v46 }
  0x29   :  { %953 = vmatpush3.bf16.msra.mxu1 %v1025_v47  ;;  %932 = vmatprep.subr.bf16.mxu0 %v1026_v48 }
  0x2a   :  { %954 = vmatprep.subr.bf16.mxu1 %v1027_v49 }
  0x2c   :  { %933 = vmatpush3.bf16.msra.mxu0 %v1028_v50 }
  0x2d   :  { %955 = vmatpush3.bf16.msra.mxu1 %v1029_v51  ;;  %934 = vmatprep.subr.bf16.mxu0 %v1030_v52 }
  0x2e   :  { %956 = vmatprep.subr.bf16.mxu1 %v1031_v53 }
  0x30   :  { %935 = vmatpush3.bf16.msra.mxu0 %v1032_v54 }
  0x31   :  { %957 = vmatpush3.bf16.msra.mxu1 %v1033_v55  ;;  %936 = vmatprep.subr.bf16.mxu0 %v1034_v56 }
  0x32   :  { %958 = vmatprep.subr.bf16.mxu1 %v1035_v57 }
  0x34   :  { %937 = vmatpush3.bf16.msra.mxu0 %v1036_v58 }
  0x35   :  { %959 = vmatpush3.bf16.msra.mxu1 %v1037_v59  ;;  %938 = vmatprep.subr.bf16.mxu0 %v1038_v60 }
  0x36   :  { %960 = vmatprep.subr.bf16.mxu1 %v1039_v61 }
  0x38   :  { %939 = vmatpush3.bf16.msra.mxu0 %v1040_v62 }
  0x39   :  { %961 = vmatpush3.bf16.msra.mxu1 %v1041_v63  ;;  %940 = vmatprep.subr.bf16.mxu0 %v1042_v0 }
  0x3a   :  { %962 = vmatprep.subr.bf16.mxu1 %v1043_v1 }
  0x3c   :  { %941 = vmatpush3.bf16.msra.mxu0 %v1044_v2 }
  0x3d   :  { %963 = vmatpush3.bf16.msra.mxu1 %v1045_v3  ;;  %942 = vmatprep.subr.bf16.mxu0 %v1046_v4 }
  0x3e   :  { %964 = vmatprep.subr.bf16.mxu1 %v1047_v5 }
  0x40   :  { %943 = vmatpush3.bf16.msra.mxu0 %v1048_v6 }
  0x41   :  { %965 = vmatpush3.bf16.msra.mxu1 %v1049_v7 }
  0x42   :  { %10 = vsyncpa [#allocation4], 0  ;;  %vm26_vm0 = vcmask 261120   ;;  %v1076_v16 = vmov 0.0   ;;  %v1050_v17 = vld [vmem:[%s1355_s3] sm:$0xff]   ;;  %vm1077_vm1 = vmmov 0  }
  0x43   :  { %670 = vmatmul.mubr.bf16.vlgmr.msra.gmra.mrb[4].mxu0 %v40_v14  ;;  %27 = vst.msk [vmem:[#allocation2] sm:$0xff] %vm26_vm0, %v1076_v16  ;;  %975 = vmatprep.subr.bf16.mxu0 %v1076_v16  ;;  %v1051_v18 = vld [vmem:[%s1355_s3 + $0x8] sm:$0xff]   ;;  %v879_v44 = vld [vmem:[%s1354_s2] ss:$0 sm:$0xff]  ;;  %s1078_s17 = smov [#allocation3]  }
  0x44   :  { %710 = vmatmul.mubr.bf16.vlgmr.msra.gmra.mrb[4].mxu1 %v42_v15  ;;  %979 = vmatprep.mubr.msk.bf16.mxu0 %vm1077_vm1, %v1076_v16  ;;  %v880_v49 = vld [vmem:[%s1356_s4] ss:$0 sm:$0xff]  ;;  %s807_s18 = sshll.u32 %s1078_s17, 4  ;;  %s808_s18 = int_to_ptr.vmem [resolvable:$true] %s807_s18 }
  0x45   :  { %976 = vmatpush3.bf16.msra.mxu0 %v1050_v17  ;;  %s1052_s2 = scalar_lea.vmem %s808_s18, 128  ;;  %p1057_p1 = scmp.lt.s32.totalorder %s808_s18, %s808_s18 }
  0x46   :  { %977 = vmatprep.subr.bf16.mxu0 %v1076_v16  ;;  %p1053_p0 = scmp.ne.s32.totalorder %s808_s18, %s1052_s2  ;;  %p1058_p2 = scmp.lt.s32.totalorder %s1052_s2, %s1052_s2 }
  0x48   :  { %p1059_p3 = por %p1058_p2, %p1057_p1 }
  0x49   :  { %978 = vmatpush3.bf16.msra.mxu0 %v1051_v18 }
  0x4a   :  { %v44_v41 = vld [vmem:[#allocation2] sm:$0xff]  ;;  %p1060_p4 = pnand %p1059_p3, %p1053_p0 }
  0xf6   :  { %v900_v19 = vpop.f32.mrb[0].mxu0 }
  0xf7   :  { %v922_v20 = vpop.f32.mrb[0].mxu1  ;;  %v901_v21 = vpop.f32.mrb[1].mxu0 }
  0xf8   :  { %v923_v22 = vpop.f32.mrb[1].mxu1  ;;  %v902_v23 = vadd.f32 %v901_v21, %v900_v19  ;;  %v903_v25 = vpop.f32.mrb[2].mxu0 }
  0xf9   :  { %v924_v24 = vadd.f32 %v923_v22, %v922_v20  ;;  %v925_v26 = vpop.f32.mrb[2].mxu1  ;;  %v904_v27 = vpop.f32.mrb[3].mxu0 }
  0xfa   :  { %v926_v28 = vpop.f32.mrb[3].mxu1 }
  0xfb   :  { %v632_v29 = vadd.f32 %v924_v24, %v902_v23 }
 0x116   :  { %v944_v30 = vpop.f32.mrb[4].mxu0 }
 0x117   :  { %v966_v31 = vpop.f32.mrb[4].mxu1  ;;  %v945_v32 = vpop.f32.mrb[5].mxu0 }
 0x118   :  { %v946_v33 = vadd.f32 %v945_v32, %v944_v30  ;;  %v967_v34 = vpop.f32.mrb[5].mxu1  ;;  %v947_v35 = vpop.f32.mrb[6].mxu0 }
 0x119   :  { %v968_v36 = vadd.f32 %v967_v34, %v966_v31  ;;  %v969_v37 = vpop.f32.mrb[6].mxu1  ;;  %v948_v38 = vpop.f32.mrb[7].mxu0 }
 0x11a   :  { %v672_v39 = vadd.f32 %v946_v33, %v632_v29  ;;  %v970_v40 = vpop.f32.mrb[7].mxu1 }
 0x11c   :  { %v712_v42 = vadd.f32 %v968_v36, %v672_v39 }
 0x11e   :  { %v717_v43 = vadd.f32 %v712_v42, %v44_v41 }
 0x120   :  { %719 = vst.msk [vmem:[#allocation2] sm:$0xff] %vm26_vm0, %v717_v43 }
 0x127   :  { %v723_v45 = vld [vmem:[#allocation2] sm:$0xff] }
 0x128   :  { %v731_v46 = vadd.f32 %v879_v44, %v723_v45 }
 0x12a   :  { %v732_v47 = vmax.f32 %v731_v46, 0.0 }
 0x12c   :  { %v733_v48 = vpack.c.bf16 %v732_v47, %v732_v47 }
 0x12e   :  { %980 = vmatmul.mubr.msk.bf16.vlgmr.msra.gmra.mrb[8].mxu0 %vm26_vm0, %v733_v48 }
 0x201   :  { %v794_v50 = vpop.f32.mrb[8].mxu0 }
 0x202   :  { %v795_v51 = vadd.f32 %v880_v49, %v794_v50  ;;  %v981_v52 = vpop.f32.mrb[9].mxu0 }
 0x203   :  { %v797_v53 = vpop.f32.mrb[10].mxu0 }
 0x204   :  { %800 = vst [vmem:[#allocation3] sm:$0xff] %v795_v51  ;;  %v982_v54 = vpop.f32.mrb[11].mxu0 }
 0x205   :  { %1063 = shalt.err (!%p1060_p4)
}
 0x206   :  { %s1064_s4 = scalar_lea.hbm %s1357_s5, 128 }
 0x207   :  { %p1065_p5 = scmp.ne.s32.totalorder %s1357_s5, %s1064_s4  ;;  %p1068_p6 = scmp.lt.u32.totalorder %s1064_s4, %s1357_s5 }
 0x209   :  { %p1070_p7 = pnand %p1068_p6, %p1065_p5 }
 0x20b   :  { %1073 = shalt.err (!%p1070_p7)
}
 0x20c   :  { %810 = dma.vmem_to_hbm [thread:$0]  %s808_s18, 128, %s1357_s5, [#allocation4]  }
 0x20d   :  { %1074 = dma.done.wait [#allocation4], 128  }
 0x20e   :  { %1075 = vsyncadd [#allocation4], 4294967168 }
 0x20f   :  { %814 = vsyncpa [#allocation4], 1 }

</bundles_post_ra>
